<compile_context>
chip_gen: v7x
topology: tpu7x:2x2x1
jax: 0.10.0
libtpu: 0.0.40
codegen_flags: <defaults>
</compile_context>

<pallas_src>
import functools

import jax
import jax.numpy as jnp
from jax import lax
from jax.experimental import pallas as pl
from jax.experimental.pallas import tpu as pltpu


_SQRT1_2 = 0.7071067811865476


# ----------------------------- Pallas kernels -----------------------------

def fused_forward_kernel(fs_ref, ft_ref, scale_ref, wb_ref, bb_ref,
                         wc_ref, bc_ref, pred_ref):
    """Single invocation, both branches fused.

    bottle Linear -> exact-erf GELU -> (Dropout = identity) -> l2_zheng
    (row L2 norm, then per-branch column L2 norm) -> cls_fc with the
    per-row Kurtosis scale applied post-matmul / pre-bias.
    """
    B = fs_ref.shape[0]
    x = jnp.concatenate([fs_ref[...], ft_ref[...]], axis=0)      # (2B, FEAT)

    # bottle + GELU (nn.GELU() default == exact erf)
    y = jnp.dot(x, wb_ref[...], preferred_element_type=jnp.float32)
    y = y + bb_ref[...]
    y = 0.5 * y * (1.0 + lax.erf(y * _SQRT1_2))

    # l2_zheng: sqrt(x^2 + eps) -> L2 row-normalize -> L2 column-normalize.
    # rsqrt lands on the EUP slot (divides would load the VALU).
    z = jnp.sqrt(y * y + 1e-08)
    z = z * lax.rsqrt(jnp.sum(z * z, axis=1, keepdims=True) + 1e-08)
    # Column normalization is per-branch (source rows 0:B, target rows B:2B),
    # matching the reference where l2_zheng sees each branch separately.
    zs = z[:B]
    zt = z[B:]
    zs = zs * lax.rsqrt(jnp.sum(zs * zs, axis=0, keepdims=True) + 1e-08)
    zt = zt * lax.rsqrt(jnp.sum(zt * zt, axis=0, keepdims=True) + 1e-08)
    z = jnp.concatenate([zs, zt], axis=0)

    # cls_fc: out = s * (z @ W) + b   (s == 1 for source rows, 0.05 for the
    # Kurtosis-selected target rows — row scaling commutes through the matmul).
    out = jnp.dot(z, wc_ref[...], preferred_element_type=jnp.float32)
    pred_ref[...] = out * scale_ref[...] + bc_ref[...]


def softmax_kl_kernel(fs_ref, ft_ref, o_ref):
    # F.kl_div(f_target.softmax().log(), f_source.softmax(), reduction='sum')
    #   = sum( p_s * (log p_s - log p_t) )
    def log_softmax(z):
        m = jnp.max(z, axis=-1, keepdims=True)
        zs = z - m
        return zs - jnp.log(jnp.sum(jnp.exp(zs), axis=-1, keepdims=True))

    ls = log_softmax(fs_ref[...])
    lt = log_softmax(ft_ref[...])
    p_s = jnp.exp(ls)
    o_ref[...] = jnp.sum(p_s * (ls - lt)).reshape(1, 1)


# ------------------------------- wrappers ----------------------------------

def _vmem_call(kernel, out_shape, *inputs):
    """Single-invocation pallas_call with all operands resident in VMEM."""
    return pl.pallas_call(
        kernel,
        out_shape=out_shape,
        in_specs=[pl.BlockSpec(memory_space=pltpu.MemorySpace.VMEM)
                  for _ in inputs],
        out_specs=pl.BlockSpec(memory_space=pltpu.MemorySpace.VMEM),
    )(*inputs)


def _fused_forward(f_source, f_target, scales, w_bottle, b_bottle,
                   w_cls_pad, b_cls_pad):
    """Both branches through one grid-less pallas_call."""
    B = f_source.shape[0]
    ncp = w_cls_pad.shape[1]
    return _vmem_call(
        fused_forward_kernel,
        jax.ShapeDtypeStruct((2 * B, ncp), jnp.float32),
        f_source, f_target, scales, w_bottle, b_bottle, w_cls_pad, b_cls_pad)


def init_params(key, feat_dim, hidden=256, num_classes=4):
    k1, k2 = jax.random.split(key, 2)
    f32 = jnp.float32
    ncp = max(128, ((num_classes + 127) // 128) * 128)  # lane-dense classifier
    w_cls = jax.random.normal(k2, (hidden, num_classes), f32) * 0.02
    return {
        "w_bottle": jax.random.normal(k1, (feat_dim, hidden), f32) * 0.02,
        "b_bottle": jnp.zeros((1, hidden), f32),
        # Padded once at init; padded columns carry zero weight/bias and are
        # sliced off in forward().
        "w_cls_pad": jnp.zeros((hidden, ncp), f32).at[:, :num_classes].set(w_cls),
        "b_cls_pad": jnp.zeros((1, ncp), f32),
    }


@functools.partial(jax.jit,
                   static_argnames=("num_positions", "num_classes",
                                    "compute_kl"))
def forward(params, f_source, f_target, target_target, num_positions,
            num_classes=4, compute_kl=False):
    """Pallas equivalent of models.forward feature/prediction path."""
    B = f_source.shape[0]
    f32 = jnp.float32

    # Kurtosis_activation: per-sample peak-to-peak of the raw target signal
    # (plain jnp — a 4 KiB reduction is not worth a kernel launch), then the
    # num_positions smallest rows get their cls_fc output scaled by 0.05.
    tt = target_target.reshape(B, -1)
    p2p = jnp.max(tt, axis=1) - jnp.min(tt, axis=1)
    k = min(int(num_positions), B)
    kth_neg = lax.top_k(-p2p, k)[0][k - 1]            # -(k-th smallest p2p)
    t_scale = jnp.where(p2p <= -kth_neg, f32(0.05), f32(1.0))
    scales = jnp.concatenate([jnp.ones((B,), f32), t_scale]).reshape(2 * B, 1)

    preds = _fused_forward(f_source, f_target, scales,
                           params["w_bottle"], params["b_bottle"],
                           params["w_cls_pad"], params["b_cls_pad"])
    s_pred = preds[:B, :num_classes]
    t_pred = preds[B:, :num_classes]

    # KL weight: loss and adv_loss are hard-coded 0 below, so the KL term
    # never affects outputs -> skipped by default (dead compute).
    if compute_kl:
        kl = _vmem_call(softmax_kl_kernel, jax.ShapeDtypeStruct((1, 1), f32),
                        f_source, f_target)[0, 0]
    else:
        kl = f32(0.0)

    # TODO(synk): kmmd_loss and AdversarialLoss are external/undefined in the
    # reference source; keep loss = 0 and adv_loss = 0 as in its defaults.
    loss = 0.0
    adv_loss = 0.0
    return s_pred, t_pred, (1.0 - kl) * loss, kl * adv_loss


# --------------------------------- main -------------------------------------

if __name__ == "__main__":
    key = jax.random.PRNGKey(0)
    kp, ks, kt, kraw, kn = jax.random.split(key, 5)

    B, FEAT, RAW_LEN, NUM_CLASSES = 8, 64, 128, 4

    params = init_params(kp, FEAT, hidden=256, num_classes=NUM_CLASSES)
    f_source = jax.random.normal(ks, (B, FEAT), jnp.float32)
    f_target = jax.random.normal(kt, (B, FEAT), jnp.float32)
    target_target = jax.random.normal(kraw, (B, RAW_LEN), jnp.float32)

    # torch.randint(10, 20, (1,)).item() -> host value, static under jit
    num_positions = int(jax.random.randint(kn, (), 10, 20))

    outs = forward(params, f_source, f_target, target_target, num_positions,
                   num_classes=NUM_CLASSES)
    jax.block_until_ready(outs)

    s_pred, t_pred, w_loss, w_adv = outs
    assert s_pred.shape == (B, NUM_CLASSES)
    assert t_pred.shape == (B, NUM_CLASSES)
    print("KERNEL_OK")
</pallas_src>

<mosaic_0001>
module attributes {stable_mosaic.version = 11 : i64} {
  func.func @fused_forward_kernel(%arg0: memref<8x64xf32, #tpu.memory_space<vmem>>, %arg1: memref<8x64xf32, #tpu.memory_space<vmem>>, %arg2: memref<16x1xf32, #tpu.memory_space<vmem>>, %arg3: memref<64x256xf32, #tpu.memory_space<vmem>>, %arg4: memref<1x256xf32, #tpu.memory_space<vmem>>, %arg5: memref<256x128xf32, #tpu.memory_space<vmem>>, %arg6: memref<1x128xf32, #tpu.memory_space<vmem>>, %arg7: memref<16x128xf32, #tpu.memory_space<vmem>>) attributes {dimension_semantics = [], scalar_prefetch = 0 : i64, scratch_operands = 0 : i64, tpu.core_type = #tpu.core_type<tc>} {
    %c0 = arith.constant 0 : index
    %c0_0 = arith.constant 0 : index
    %0 = vector.load %arg0[%c0, %c0_0] : memref<8x64xf32, #tpu.memory_space<vmem>>, vector<8x64xf32>
    %c0_1 = arith.constant 0 : index
    %c0_2 = arith.constant 0 : index
    %1 = vector.load %arg1[%c0_1, %c0_2] : memref<8x64xf32, #tpu.memory_space<vmem>>, vector<8x64xf32>
    %2 = tpu.concatenate %0, %1 in 0 : vector<8x64xf32>, vector<8x64xf32> -> vector<16x64xf32>
    %c0_3 = arith.constant 0 : index
    %c0_4 = arith.constant 0 : index
    %3 = vector.load %arg3[%c0_3, %c0_4] : memref<64x256xf32, #tpu.memory_space<vmem>>, vector<64x256xf32>
    %cst = arith.constant dense<0.000000e+00> : vector<16x256xf32>
    %4 = tpu.matmul %2, %3, %cst {dimension_numbers = #tpu.dot_dimension_numbers<[1], [0], [0], [1], [0, 0, 1, 1], [], []>} : vector<16x64xf32>, vector<64x256xf32>, vector<16x256xf32> -> vector<16x256xf32>
    %c0_5 = arith.constant 0 : index
    %c0_6 = arith.constant 0 : index
    %5 = vector.load %arg4[%c0_5, %c0_6] : memref<1x256xf32, #tpu.memory_space<vmem>>, vector<1x256xf32>
    %6 = vector.broadcast %5 : vector<1x256xf32> to vector<16x256xf32>
    %7 = arith.addf %4, %6 : vector<16x256xf32>
    %cst_7 = arith.constant 5.000000e-01 : f32
    %8 = vector.broadcast %cst_7 : f32 to vector<16x256xf32>
    %9 = arith.mulf %8, %7 : vector<16x256xf32>
    %cst_8 = arith.constant 0.707106769 : f32
    %10 = vector.broadcast %cst_8 : f32 to vector<16x256xf32>
    %11 = arith.mulf %7, %10 : vector<16x256xf32>
    %12 = math.erf %11 : vector<16x256xf32>
    %cst_9 = arith.constant 1.000000e+00 : f32
    %13 = vector.broadcast %cst_9 : f32 to vector<16x256xf32>
    %14 = arith.addf %13, %12 : vector<16x256xf32>
    %15 = arith.mulf %9, %14 : vector<16x256xf32>
    %16 = arith.mulf %15, %15 : vector<16x256xf32>
    %cst_10 = arith.constant 9.99999993E-9 : f32
    %17 = vector.broadcast %cst_10 : f32 to vector<16x256xf32>
    %18 = arith.addf %16, %17 : vector<16x256xf32>
    %19 = math.sqrt %18 : vector<16x256xf32>
    %20 = arith.mulf %19, %19 : vector<16x256xf32>
    %cst_11 = arith.constant dense<0.000000e+00> : vector<16xf32>
    %21 = vector.multi_reduction <add>, %20, %cst_11 [1] : vector<16x256xf32> to vector<16xf32>
    %22 = vector.shape_cast %21 : vector<16xf32> to vector<16x1xf32>
    %cst_12 = arith.constant 9.99999993E-9 : f32
    %23 = vector.broadcast %cst_12 : f32 to vector<16x1xf32>
    %24 = arith.addf %22, %23 : vector<16x1xf32>
    %25 = math.rsqrt %24 : vector<16x1xf32>
    %26 = vector.broadcast %25 : vector<16x1xf32> to vector<16x256xf32>
    %27 = arith.mulf %19, %26 : vector<16x256xf32>
    %28 = vector.extract_strided_slice %27 {offsets = [0, 0], sizes = [8, 256], strides = [1, 1]} : vector<16x256xf32> to vector<8x256xf32>
    %29 = vector.extract_strided_slice %27 {offsets = [8, 0], sizes = [8, 256], strides = [1, 1]} : vector<16x256xf32> to vector<8x256xf32>
    %30 = arith.mulf %28, %28 : vector<8x256xf32>
    %cst_13 = arith.constant dense<0.000000e+00> : vector<256xf32>
    %31 = vector.multi_reduction <add>, %30, %cst_13 [0] : vector<8x256xf32> to vector<256xf32>
    %32 = vector.shape_cast %31 : vector<256xf32> to vector<1x256xf32>
    %cst_14 = arith.constant 9.99999993E-9 : f32
    %33 = vector.broadcast %cst_14 : f32 to vector<1x256xf32>
    %34 = arith.addf %32, %33 : vector<1x256xf32>
    %35 = math.rsqrt %34 : vector<1x256xf32>
    %36 = vector.broadcast %35 : vector<1x256xf32> to vector<8x256xf32>
    %37 = arith.mulf %28, %36 : vector<8x256xf32>
    %38 = arith.mulf %29, %29 : vector<8x256xf32>
    %cst_15 = arith.constant dense<0.000000e+00> : vector<256xf32>
    %39 = vector.multi_reduction <add>, %38, %cst_15 [0] : vector<8x256xf32> to vector<256xf32>
    %40 = vector.shape_cast %39 : vector<256xf32> to vector<1x256xf32>
    %cst_16 = arith.constant 9.99999993E-9 : f32
    %41 = vector.broadcast %cst_16 : f32 to vector<1x256xf32>
    %42 = arith.addf %40, %41 : vector<1x256xf32>
    %43 = math.rsqrt %42 : vector<1x256xf32>
    %44 = vector.broadcast %43 : vector<1x256xf32> to vector<8x256xf32>
    %45 = arith.mulf %29, %44 : vector<8x256xf32>
    %46 = tpu.concatenate %37, %45 in 0 : vector<8x256xf32>, vector<8x256xf32> -> vector<16x256xf32>
    %c0_17 = arith.constant 0 : index
    %c0_18 = arith.constant 0 : index
    %47 = vector.load %arg5[%c0_17, %c0_18] : memref<256x128xf32, #tpu.memory_space<vmem>>, vector<256x128xf32>
    %cst_19 = arith.constant dense<0.000000e+00> : vector<16x128xf32>
    %48 = tpu.matmul %46, %47, %cst_19 {dimension_numbers = #tpu.dot_dimension_numbers<[1], [0], [0], [1], [0, 0, 1, 1], [], []>} : vector<16x256xf32>, vector<256x128xf32>, vector<16x128xf32> -> vector<16x128xf32>
    %c0_20 = arith.constant 0 : index
    %c0_21 = arith.constant 0 : index
    %49 = vector.load %arg2[%c0_20, %c0_21] : memref<16x1xf32, #tpu.memory_space<vmem>>, vector<16x1xf32>
    %50 = vector.broadcast %49 : vector<16x1xf32> to vector<16x128xf32>
    %51 = arith.mulf %48, %50 : vector<16x128xf32>
    %c0_22 = arith.constant 0 : index
    %c0_23 = arith.constant 0 : index
    %52 = vector.load %arg6[%c0_22, %c0_23] : memref<1x128xf32, #tpu.memory_space<vmem>>, vector<1x128xf32>
    %53 = vector.broadcast %52 : vector<1x128xf32> to vector<16x128xf32>
    %54 = arith.addf %51, %53 : vector<16x128xf32>
    %c0_24 = arith.constant 0 : index
    %c0_25 = arith.constant 0 : index
    %55 = vector.load %arg7[%c0_24, %c0_25] : memref<16x128xf32, #tpu.memory_space<vmem>>, vector<16x128xf32>
    tpu.vector_store %arg7[%c0_24, %c0_25], %54 {strides = array<i32>} : memref<16x128xf32, #tpu.memory_space<vmem>>, vector<16x128xf32>,
    return
  }
}

</mosaic_0001>

<bundles_post_ra>
// kernel: forward.1
= control target key start
LH: loop header
LB: loop body
LE: loop exit
PB: predicated region body
PF: predicated region fallthrough
CT: control target
= control target key end

     0   :  { %12 = vsyncpa [#allocation3], 0  ;;  %s711_s0 = inlined_call_operand.vmem [shape: f32[8,64], index: 0, kind: input, shape index: {}]   ;;  %s712_s1 = inlined_call_operand.vmem [shape: f32[8,64], index: 1, kind: input, shape index: {}]   ;;  %s713_s2 = inlined_call_operand.vmem [shape: f32[16,1], index: 2, kind: input, shape index: {}]   ;;  %s714_s3 = inlined_call_operand.hbm [shape: f32[64,256], index: 3, kind: input, shape index: {}]   ;;  %s715_s4 = inlined_call_operand.vmem [shape: f32[1,256], index: 4, kind: input, shape index: {}]   ;;  %s716_s5 = inlined_call_operand.hbm [shape: f32[256,128], index: 5, kind: input, shape index: {}]   ;;  %s717_s6 = inlined_call_operand.vmem [shape: f32[1,128], index: 6, kind: input, shape index: {}]   ;;  %s718_s7 = inlined_call_operand.vmem [shape: f32[16,128], index: 7, kind: output, shape index: {}]  }
   0x1   :  { %13 = vsyncpa [#allocation5], 0  ;;  %s595_s24 = smov [#allocation2]   ;;  %s547_s28 = scalar_lea.hbm %s714_s3, 2048 }
   0x2   :  { %s25_s25 = sshll.u32 %s595_s24, 4  ;;  %p548_p0 = scmp.ne.s32.totalorder %s714_s3, %s547_s28  ;;  %s26_s25 = int_to_ptr.vmem [resolvable:$true] %s25_s25 }
   0x3   :  { %p551_p1 = scmp.lt.u32.totalorder %s547_s28, %s714_s3 }
   0x5   :  { %p553_p2 = pnand %p551_p1, %p548_p0 }
   0x7   :  { %556 = shalt.err (!%p553_p2)
}
   0x8   :  { %s557_s10 = scalar_lea.vmem %s26_s25, 2048  ;;  %p562_p4 = scmp.lt.s32.totalorder %s26_s25, %s26_s25 }
   0x9   :  { %p558_p3 = scmp.ne.s32.totalorder %s26_s25, %s557_s10  ;;  %p563_p5 = scmp.lt.s32.totalorder %s557_s10, %s557_s10 }
   0xb   :  { %p564_p6 = por %p563_p5, %p562_p4 }
   0xd   :  { %p565_p7 = pnand %p564_p6, %p558_p3 }
   0xf   :  { %568 = shalt.err (!%p565_p7)
}
  0x10   :  { %s596_s11 = smov 256   ;;  %s597_s12 = smov 16  }
  0x11   :  { %31 = dma.hbm_to_vmem [thread:$0]  %s714_s3, 2048, %s26_s25, [#allocation3], %s596_s11, %s596_s11, %s597_s12  }
  0x12   :  { %s598_s15 = smov [#allocation4]   ;;  %s569_s19 = scalar_lea.hbm %s716_s5, 4096 }
  0x13   :  { %s39_s16 = sshll.u32 %s598_s15, 4  ;;  %p570_p8 = scmp.ne.s32.totalorder %s716_s5, %s569_s19  ;;  %s40_s16 = int_to_ptr.vmem [resolvable:$true] %s39_s16 }
  0x14   :  { %p573_p9 = scmp.lt.u32.totalorder %s569_s19, %s716_s5 }
  0x16   :  { %p575_p10 = pnand %p573_p9, %p570_p8 }
  0x18   :  { %578 = shalt.err (!%p575_p10)
}
  0x19   :  { %s579_s24 = scalar_lea.vmem %s40_s16, 4096  ;;  %p584_p12 = scmp.lt.s32.totalorder %s40_s16, %s40_s16 }
  0x1a   :  { %p580_p11 = scmp.ne.s32.totalorder %s40_s16, %s579_s24  ;;  %p585_p13 = scmp.lt.s32.totalorder %s579_s24, %s579_s24 }
  0x1c   :  { %p586_p0 = por %p585_p13, %p584_p12 }
  0x1e   :  { %p587_p1 = pnand %p586_p0, %p580_p11 }
  0x20   :  { %590 = shalt.err (!%p587_p1)
}
  0x21   :  { %s599_s3 = smov 128   ;;  %s600_s25 = smov 8  }
  0x22   :  { %45 = dma.hbm_to_vmem [thread:$0]  %s716_s5, 4096, %s40_s16, [#allocation5], %s599_s3, %s599_s3, %s600_s25  }
  0x23   :  { %591 = dma.done.wait [#allocation3], 2048  }
  0x24   :  { %592 = vsyncadd [#allocation3], 4294965248 }
  0x25   :  { %593 = dma.done.wait [#allocation5], 4096  }
  0x26   :  { %594 = vsyncadd [#allocation5], 4294963200  ;;  %v601_v0 = vmov 0.0   ;;  %v57_v1 = vld [vmem:[#allocation2 + $0x8] sm:$0xff]  ;;  %v59_v2 = vld [vmem:[#allocation2 + $0x18] sm:$0xff]  ;;  %vm84_vm0 = vcmask 523264   ;;  %v74_v27 = vlaneseq }
  0x27   :  { %155 = vmatprep.mubr.f32.mxu0 %v601_v0  ;;  %v56_v3 = vld [vmem:[#allocation2] sm:$0xff]  ;;  %v461_v4 = vpack.c.bf16 %v59_v2, %v57_v1  ;;  %v58_v5 = vld [vmem:[#allocation2 + $0x10] sm:$0xff]  ;;  %v61_v6 = vld [vmem:[#allocation2 + $0x28] sm:$0xff] }
  0x28   :  { %v63_v7 = vld [vmem:[#allocation2 + $0x38] sm:$0xff]  ;;  %v463_v8 = vpack.c.bf16 %v58_v5, %v56_v3  ;;  %v60_v10 = vld [vmem:[#allocation2 + $0x20] sm:$0xff]  ;;  %v62_v11 = vld [vmem:[#allocation2 + $0x30] sm:$0xff]  ;;  %v75_v28 = vshrl.u32 %v74_v27, 7 }
  0x29   :  { %v465_v9 = vpack.c.bf16 %v63_v7, %v61_v6  ;;  %v65_v12 = vld [vmem:[#allocation2 + $0x48] sm:$0xff]  ;;  %462 = vmatprep.subr.bf16.mxu0 %v461_v4  ;;  %v67_v13 = vld [vmem:[#allocation2 + $0x58] sm:$0xff]  ;;  %v467_v14 = vpack.c.bf16 %v62_v11, %v60_v10  ;;  %v64_v16 = vld [vmem:[#allocation2 + $0x40] sm:$0xff] }
  0x2a   :  { %464 = vmatpush1.bf16.msra.mxu0 %v463_v8  ;;  %v469_v15 = vpack.c.bf16 %v67_v13, %v65_v12  ;;  %v66_v17 = vld [vmem:[#allocation2 + $0x50] sm:$0xff]  ;;  %v69_v18 = vld [vmem:[#allocation2 + $0x68] sm:$0xff]  ;;  %v71_v19 = vld [vmem:[#allocation2 + $0x78] sm:$0xff]  ;;  %v76_v29 = vsub.s32 0, %v75_v28  ;;  %v80_v31 = vsub.s32 1, %v75_v28 }
  0x2b   :  { %466 = vmatprep.subr.bf16.mxu0 %v465_v9  ;;  %v471_v20 = vpack.c.bf16 %v66_v17, %v64_v16  ;;  %v473_v21 = vpack.c.bf16 %v71_v19, %v69_v18  ;;  %v68_v22 = vld [vmem:[#allocation2 + $0x60] sm:$0xff]  ;;  %v70_v23 = vld [vmem:[#allocation2 + $0x70] sm:$0xff] }
  0x2c   :  { %v475_v24 = vpack.c.bf16 %v70_v23, %v68_v22  ;;  %v54_v25 = vld [vmem:[%s711_s0] sm:$0xff] }
  0x2d   :  { %v55_v26 = vld [vmem:[%s712_s1] sm:$0xff] }
  0x2e   :  { %468 = vmatpush1.bf16.msra.mxu0 %v467_v14  ;;  %v72_v30 = vld [vmem:[%s715_s4] sm:$0x3] }
  0x2f   :  { %470 = vmatprep.subr.bf16.mxu0 %v469_v15  ;;  %v77_v32 = vrot.slane %v72_v30, %v76_v29  ;;  %v81_v33 = vrot.slane %v72_v30, %v80_v31 }
  0x32   :  { %472 = vmatpush1.bf16.msra.mxu0 %v471_v20 }
  0x33   :  { %474 = vmatprep.subr.bf16.mxu0 %v473_v21 }
  0x36   :  { %476 = vmatpush1.bf16.msra.mxu0 %v475_v24 }
  0x39   :  { %420 = vmatmul.mubr.msk.f32.vlgmr.msra.gmra.mrb[0].mxu0 %vm84_vm0, %v54_v25 }
  0x3a   :  { %161 = vmatprep.mubr.f32.mxu0 %v601_v0 }
  0x3d   :  { %421 = vmatmul.mubr.msk.f32.gmra.mrb[2].mxu0 %vm84_vm0, %v55_v26 }
 0x10c   :  { %v157_v34 = vpop.f32.mrb[0].mxu0 }
 0x10d   :  { %v158_v35 = vadd.f32 %v157_v34, %v77_v32  ;;  %v159_v36 = vpop.f32.mrb[1].mxu0  ;;  %v282_v34 = vld [vmem:[#allocation4] sm:$0xff] }
 0x10e   :  { %v160_v37 = vadd.f32 %v159_v36, %v81_v33  ;;  %v283_v36 = vld [vmem:[#allocation4 + $0x8] sm:$0xff] }
 0x10f   :  { %v172_v38 = vmul.f32 0.70710677, %v158_v35  ;;  %v168_v48 = vmul.f32 0.5, %v158_v35 }
 0x110   :  { %v173_v39 = vmul.f32 0.70710677, %v160_v37  ;;  %v163_v40 = vpop.f32.mrb[2].mxu0  ;;  %v169_v50 = vmul.f32 0.5, %v160_v37  ;;  %v300_v37 = vld [vmem:[#allocation4 + $0x90] sm:$0xff] }
 0x111   :  { %519 = verf.f32 %v172_v38  ;;  %v164_v41 = vadd.f32 %v163_v40, %v77_v32  ;;  %v165_v42 = vpop.f32.mrb[3].mxu0  ;;  %v298_v32 = vld [vmem:[#allocation4 + $0x80] sm:$0xff]  ;;  %v301_v38 = vld [vmem:[#allocation4 + $0x98] sm:$0xff] }
 0x112   :  { %521 = verf.f32 %v173_v39  ;;  %v166_v43 = vadd.f32 %v165_v42, %v81_v33  ;;  %v299_v33 = vld [vmem:[#allocation4 + $0x88] sm:$0xff]  ;;  %v479_v39 = vpack.c.bf16 %v283_v36, %v282_v34  ;;  %v481_v40 = vpack.c.bf16 %v301_v38, %v300_v37  ;;  %v285_v42 = vld [vmem:[#allocation4 + $0x18] sm:$0xff] }
 0x113   :  { %v174_v44 = vmul.f32 0.70710677, %v164_v41  ;;  %v170_v57 = vmul.f32 0.5, %v164_v41  ;;  %v477_v35 = vpack.c.bf16 %v299_v33, %v298_v32  ;;  %v284_v41 = vld [vmem:[#allocation4 + $0x10] sm:$0xff] }
 0x114   :  { %v175_v45 = vmul.f32 0.70710677, %v166_v43  ;;  %v171_v60 = vmul.f32 0.5, %v166_v43  ;;  %v302_v43 = vld [vmem:[#allocation4 + $0xa0] sm:$0xff] }
 0x115   :  { %523 = verf.f32 %v174_v44  ;;  %478 = vmatprep.subr.bf16.mxu1 %v477_v35  ;;  %v303_v44 = vld [vmem:[#allocation4 + $0xa8] sm:$0xff] }
 0x116   :  { %525 = verf.f32 %v175_v45  ;;  %480 = vmatpush3.bf16.msra.mxu1 %v479_v39  ;;  %v483_v45 = vpack.c.bf16 %v285_v42, %v284_v41 }
 0x117   :  { %482 = vmatprep.subr.bf16.mxu1 %v481_v40 }
 0x11a   :  { %484 = vmatpush3.bf16.msra.mxu1 %v483_v45 }
 0x11b   :  { %v520_v46 = vpop.eup %519 }
 0x11c   :  { %v522_v47 = vpop.eup %521  ;;  %v180_v49 = vadd.f32 1.0, %v520_v46  ;;  %v485_v46 = vpack.c.bf16 %v303_v44, %v302_v43 }
 0x11d   :  { %v181_v51 = vadd.f32 1.0, %v522_v47  ;;  %v286_v47 = vld [vmem:[#allocation4 + $0x20] sm:$0xff] }
 0x11e   :  { %v184_v52 = vmul.f32 %v180_v49, %v168_v48  ;;  %v287_v48 = vld [vmem:[#allocation4 + $0x28] sm:$0xff]  ;;  %v304_v49 = vld [vmem:[#allocation4 + $0xb0] sm:$0xff]  ;;  %486 = vmatprep.subr.bf16.mxu1 %v485_v46 }
 0x11f   :  { %v524_v53 = vpop.eup %523  ;;  %v185_v54 = vmul.f32 %v181_v51, %v169_v50  ;;  %v305_v50 = vld [vmem:[#allocation4 + $0xb8] sm:$0xff]  ;;  %v487_v51 = vpack.c.bf16 %v287_v48, %v286_v47 }
 0x120   :  { %v526_v55 = vpop.eup %525  ;;  %v188_v56 = vmul.f32 %v184_v52, %v184_v52  ;;  %v182_v58 = vadd.f32 1.0, %v524_v53  ;;  %v489_v52 = vpack.c.bf16 %v305_v50, %v304_v49  ;;  %v288_v53 = vld [vmem:[#allocation4 + $0x30] sm:$0xff] }
 0x121   :  { %v189_v59 = vmul.f32 %v185_v54, %v185_v54  ;;  %v183_v61 = vadd.f32 1.0, %v526_v55  ;;  %v289_v54 = vld [vmem:[#allocation4 + $0x38] sm:$0xff]  ;;  %v306_v55 = vld [vmem:[#allocation4 + $0xc0] sm:$0xff]  ;;  %488 = vmatpush3.bf16.msra.mxu1 %v487_v51 }
 0x122   :  { %v192_v62 = vadd.f32 1e-08, %v188_v56  ;;  %v186_v63 = vmul.f32 %v182_v58, %v170_v57  ;;  %v307_v56 = vld [vmem:[#allocation4 + $0xc8] sm:$0xff]  ;;  %v491_v57 = vpack.c.bf16 %v289_v54, %v288_v53  ;;  %490 = vmatprep.subr.bf16.mxu1 %v489_v52 }
 0x123   :  { %v193_v0 = vadd.f32 1e-08, %v189_v59  ;;  %v187_v1 = vmul.f32 %v183_v61, %v171_v60  ;;  %v493_v58 = vpack.c.bf16 %v307_v56, %v306_v55  ;;  %v290_v59 = vld [vmem:[#allocation4 + $0x40] sm:$0xff]  ;;  %v291_v60 = vld [vmem:[#allocation4 + $0x48] sm:$0xff]  ;;  %v308_v61 = vld [vmem:[#allocation4 + $0xd0] sm:$0xff] }
 0x124   :  { %v190_v2 = vmul.f32 %v186_v63, %v186_v63  ;;  %527 = vrsqrt.f32 %v192_v62  ;;  %vm198_vm1 = vcmp.eq.f32.partialorder %v192_v62, inf  ;;  %v201_v9 = vand.u32 2147483648, %v192_v62 }
 0x125   :  { %v191_v3 = vmul.f32 %v187_v1, %v187_v1  ;;  %529 = vrsqrt.f32 %v193_v0  ;;  %vm200_vm2 = vcmp.eq.f32.partialorder %v192_v62, 0.0  ;;  %vm205_vm3 = vcmp.eq.f32.partialorder %v193_v0, inf  ;;  %492 = vmatpush3.bf16.msra.mxu1 %v491_v57  ;;  %v292_v1 = vld [vmem:[#allocation4 + $0x50] sm:$0xff] }
 0x126   :  { %v194_v4 = vadd.f32 1e-08, %v190_v2  ;;  %v208_v12 = vand.u32 2147483648, %v193_v0  ;;  %vm207_vm4 = vcmp.eq.f32.partialorder %v193_v0, 0.0  ;;  %v495_v63 = vpack.c.bf16 %v291_v60, %v290_v59  ;;  %494 = vmatprep.subr.bf16.mxu1 %v493_v58  ;;  %v293_v2 = vld [vmem:[#allocation4 + $0x58] sm:$0xff] }
 0x127   :  { %v195_v5 = vadd.f32 1e-08, %v191_v3  ;;  %v310_v3 = vld [vmem:[#allocation4 + $0xe0] sm:$0xff] }
 0x128   :  { %531 = vrsqrt.f32 %v194_v4  ;;  %vm212_vm5 = vcmp.eq.f32.partialorder %v194_v4, inf  ;;  %v215_v21 = vand.u32 2147483648, %v194_v4  ;;  %vm214_vm6 = vcmp.eq.f32.partialorder %v194_v4, 0.0 }
 0x129   :  { %533 = vrsqrt.f32 %v195_v5  ;;  %vm219_vm7 = vcmp.eq.f32.partialorder %v195_v5, inf  ;;  %v222_v24 = vand.u32 2147483648, %v195_v5  ;;  %vm221_vm8 = vcmp.eq.f32.partialorder %v195_v5, 0.0  ;;  %496 = vmatpush3.bf16.msra.mxu1 %v495_v63 }
 0x12e   :  { %v528_v6 = vpop.eup %527 }
 0x12f   :  { %v530_v7 = vpop.eup %529  ;;  %v197_v8 = vmul.f32 %v528_v6, %v192_v62 }
 0x130   :  { %v204_v10 = vmul.f32 %v530_v7, %v193_v0  ;;  %v294_v7 = vld [vmem:[#allocation4 + $0x60] sm:$0xff] }
 0x131   :  { %v199_v11 = vsel %vm198_vm1, %v192_v62, %v197_v8  ;;  %v309_v62 = vld [vmem:[#allocation4 + $0xd8] sm:$0xff]  ;;  %v295_v8 = vld [vmem:[#allocation4 + $0x68] sm:$0xff] }
 0x132   :  { %v532_v13 = vpop.eup %531  ;;  %v676_v14 = vsel %vm200_vm2, %v201_v9, %v199_v11  ;;  %v206_v15 = vsel %vm205_vm3, %v193_v0, %v204_v10  ;;  %v497_v0 = vpack.c.bf16 %v309_v62, %v308_v61  ;;  %v312_v9 = vld [vmem:[#allocation4 + $0xf0] sm:$0xff]  ;;  %v313_v10 = vld [vmem:[#allocation4 + $0xf8] sm:$0xff]  ;;  %v503_v11 = vpack.c.bf16 %v295_v8, %v294_v7 }
 0x133   :  { %v534_v16 = vpop.eup %533  ;;  %v678_v17 = vsel %vm207_vm4, %v208_v12, %v206_v15  ;;  %v224_v18 = vmul.f32 %v676_v14, %v676_v14  ;;  %v211_v19 = vmul.f32 %v532_v13, %v194_v4  ;;  %v505_v12 = vpack.c.bf16 %v313_v10, %v312_v9  ;;  %v296_v13 = vld [vmem:[#allocation4 + $0x70] sm:$0xff]  ;;  %v297_v15 = vld [vmem:[#allocation4 + $0x78] sm:$0xff]  ;;  %v422_v9 = vld [vmem:[%s717_s6] ss:$0 sm:$0xff] }
 0x134   :  { %v225_v20 = vmul.f32 %v678_v17, %v678_v17  ;;  %v218_v22 = vmul.f32 %v534_v16, %v195_v5  ;;  %498 = vmatprep.subr.bf16.mxu1 %v497_v0  ;;  %v507_v16 = vpack.c.bf16 %v297_v15, %v296_v13 }
 0x135   :  { %v213_v23 = vsel %vm212_vm5, %v194_v4, %v211_v19  ;;  %v311_v4 = vld [vmem:[#allocation4 + $0xe8] sm:$0xff]  ;;  %v602_v19 = vmov 0  }
 0x136   :  { %v228_v25 = vadd.f32 %v225_v20, %v224_v18  ;;  %v684_v26 = vsel %vm214_vm6, %v215_v21, %v213_v23  ;;  %v220_v27 = vsel %vm219_vm7, %v195_v5, %v218_v22  ;;  %v499_v5 = vpack.c.bf16 %v293_v2, %v292_v1  ;;  %v389_v18 = vld [vmem:[%s713_s2] sm:$0xff]  ;;  %517 = vset.pattern.permute.xlu1 %v602_v19  ;;  %v390_v20 = vld [vmem:[%s713_s2 + $0x8] sm:$0xff] }
 0x137   :  { %v686_v28 = vsel %vm221_vm8, %v222_v24, %v220_v27  ;;  %v226_v29 = vmul.f32 %v684_v26, %v684_v26  ;;  %v501_v6 = vpack.c.bf16 %v311_v4, %v310_v3  ;;  %518 = vset.pattern.permute.xlu0 %v602_v19  ;;  %393 = vperm.xlu1 %517, %v389_v18  }
 0x138   :  { %229 = vadd.xlane.f32.xlu0 %v228_v25  ;;  %v227_v30 = vmul.f32 %v686_v28, %v686_v28  ;;  %500 = vmatpush3.bf16.msra.mxu1 %v499_v5 }
 0x139   :  { %502 = vmatprep.subr.bf16.mxu1 %v501_v6 }
 0x13a   :  { %v231_v31 = vadd.f32 %v227_v30, %v226_v29 }
 0x13b   :  { %398 = vperm.xlu1 %517, %v390_v20  }
 0x13c   :  { %232 = vadd.xlane.f32.xlu0 %v231_v31  ;;  %504 = vmatpush3.bf16.msra.mxu1 %v503_v11 }
 0x13d   :  { %506 = vmatprep.subr.bf16.mxu1 %v505_v12 }
 0x140   :  { %508 = vmatpush3.bf16.msra.mxu1 %v507_v16 }
 0x1b6   :  { %v394_v6 = vpop.permute.xlu1 %393 }
 0x1ba   :  { %v399_v16 = vpop.permute.xlu1 %398 }
 0x1c5   :  { %v230_v21 = vpop.xlane.xlu0 %229 }
 0x1c6   :  { %v234_v22 = vadd.f32 1e-08, %v230_v21 }
 0x1c8   :  { %535 = vrsqrt.f32 %v234_v22 }
 0x1c9   :  { %v233_v23 = vpop.xlane.xlu0 %232 }
 0x1ca   :  { %v235_v24 = vadd.f32 1e-08, %v233_v23 }
 0x1cc   :  { %537 = vrsqrt.f32 %v235_v24 }
 0x1d2   :  { %v536_v25 = vpop.eup %535 }
 0x1d3   :  { %v239_v27 = vmul.f32 %v536_v25, %v678_v17  ;;  %v238_v29 = vmul.f32 %v536_v25, %v676_v14 }
 0x1d5   :  { %v243_v30 = vmul.f32 %v239_v27, %v239_v27  ;;  %v242_v31 = vmul.f32 %v238_v29, %v238_v29 }
 0x1d6   :  { %v538_v32 = vpop.eup %537 }
 0x1d7   :  { %v250_v33 = vrot.slane %v243_v30, 4  ;;  %v244_v34 = vrot.slane %v242_v31, 4  ;;  %v241_v35 = vmul.f32 %v538_v32, %v686_v28  ;;  %v240_v36 = vmul.f32 %v538_v32, %v684_v26 }
 0x1d9   :  { %v251_v37 = vadd.f32 %v250_v33, %v243_v30  ;;  %v245_v38 = vadd.f32 %v244_v34, %v242_v31  ;;  %v263_v39 = vmul.f32 %v241_v35, %v241_v35  ;;  %v262_v40 = vmul.f32 %v240_v36, %v240_v36 }
 0x1db   :  { %v252_v41 = vrot.slane %v251_v37, 2  ;;  %v246_v42 = vrot.slane %v245_v38, 2  ;;  %v270_v43 = vrot.slane %v263_v39, 4  ;;  %v264_v44 = vrot.slane %v262_v40, 4 }
 0x1dd   :  { %v253_v17 = vadd.f32 %v252_v41, %v251_v37  ;;  %v247_v45 = vadd.f32 %v246_v42, %v245_v38  ;;  %v271_v14 = vadd.f32 %v270_v43, %v263_v39  ;;  %v265_v46 = vadd.f32 %v264_v44, %v262_v40 }
 0x1df   :  { %v254_v47 = vrot.slane %v253_v17, 1  ;;  %v248_v48 = vrot.slane %v247_v45, 1  ;;  %v272_v49 = vrot.slane %v271_v14, 2  ;;  %v266_v50 = vrot.slane %v265_v46, 2 }
 0x1e1   :  { %v255_v51 = vadd.f32 %v254_v47, %v253_v17  ;;  %v249_v28 = vadd.f32 %v248_v48, %v247_v45  ;;  %v273_v52 = vadd.f32 %v272_v49, %v271_v14  ;;  %v267_v26 = vadd.f32 %v266_v50, %v265_v46 }
 0x1e3   :  { %v257_v53 = vadd.f32 1e-08, %v255_v51  ;;  %v256_v54 = vadd.f32 1e-08, %v249_v28  ;;  %v274_v55 = vrot.slane %v273_v52, 1  ;;  %v268_v56 = vrot.slane %v267_v26, 1 }
 0x1e5   :  { %539 = vrsqrt.f32 %v257_v53  ;;  %v275_v57 = vadd.f32 %v274_v55, %v273_v52  ;;  %v269_v58 = vadd.f32 %v268_v56, %v267_v26 }
 0x1e6   :  { %541 = vrsqrt.f32 %v256_v54 }
 0x1e7   :  { %v277_v59 = vadd.f32 1e-08, %v275_v57  ;;  %v276_v60 = vadd.f32 1e-08, %v269_v58 }
 0x1e9   :  { %543 = vrsqrt.f32 %v277_v59 }
 0x1ea   :  { %545 = vrsqrt.f32 %v276_v60 }
 0x1ef   :  { %v540_v61 = vpop.eup %539 }
 0x1f0   :  { %v542_v62 = vpop.eup %541  ;;  %v261_v63 = vmul.f32 %v540_v61, %v239_v27 }
 0x1f1   :  { %v260_v0 = vmul.f32 %v542_v62, %v238_v29 }
 0x1f2   :  { %378 = vmatprep.mubr.f32.mxu1 %v261_v63 }
 0x1f3   :  { %v544_v1 = vpop.eup %543  ;;  %379 = vmatmul.mubr.f32.vlgmr.msra.gmra.mrb[0].mxu1 %v260_v0 }
 0x1f4   :  { %v546_v2 = vpop.eup %545  ;;  %v281_v3 = vmul.f32 %v544_v1, %v241_v35 }
 0x1f5   :  { %v280_v4 = vmul.f32 %v546_v2, %v240_v36 }
 0x1f6   :  { %383 = vmatprep.mubr.f32.mxu1 %v281_v3 }
 0x1f7   :  { %384 = vmatmul.mubr.f32.gmra.mrb[2].mxu1 %v280_v4 }
 0x2c6   :  { %v455_v5 = vpop.f32.mrb[0].mxu1 }
 0x2c7   :  { %v456_v7 = vpop.f32.mrb[1].mxu1 }
 0x2c8   :  { %v457_v8 = vadd.f32 %v456_v7, %v455_v5 }
 0x2ca   :  { %v401_v10 = vmul.f32 %v457_v8, %v394_v6  ;;  %v458_v11 = vpop.f32.mrb[2].mxu1 }
 0x2cb   :  { %v459_v12 = vpop.f32.mrb[3].mxu1 }
 0x2cc   :  { %v410_v13 = vadd.f32 %v422_v9, %v401_v10  ;;  %v460_v15 = vadd.f32 %v459_v12, %v458_v11 }
 0x2ce   :  { %412 = vst [vmem:[%s718_s7] sm:$0xff] %v410_v13  ;;  %v402_v18 = vmul.f32 %v460_v15, %v399_v16 }
 0x2d0   :  { %v411_v19 = vadd.f32 %v422_v9, %v402_v18 }
 0x2d2   :  { %413 = vst [vmem:[%s718_s7 + $0x8] sm:$0xff] %v411_v19 }
 0x2d3   :  { %418 = vsyncpa [#allocation3], 1 }
 0x2d4   :  { %419 = vsyncpa [#allocation5], 1 }

</bundles_post_ra>
